<compile_context>
chip_gen: v6e
topology: v6e:2x2x1
jax: 0.10.0
libtpu: 0.0.40
codegen_flags: <defaults>
</compile_context>

<pallas_src>
import functools

import jax
import jax.numpy as jnp
from jax import lax
from jax.experimental import pallas as pl
from jax.experimental.pallas import tpu as pltpu


def _round_up(a: int, b: int) -> int:
    return ((a + b - 1) // b) * b


def _choose_tm(n: int, input_dim: int, hidden: int,
               vmem_budget_bytes: int = 16 << 20) -> int:
    """Row-tile size: as large as the VMEM budget allows, lane-dense, >=4 grid steps."""
    # Per-row f32 VMEM cost: double-buffered x rows + (H, TM) intermediates + out.
    bytes_per_row = 4 * (2 * input_dim + 4 * hidden + 2)
    tm = (vmem_budget_bytes // bytes_per_row) // 128 * 128
    tm = max(128, min(tm, 8192))
    if n > 0:
        # Keep >= ~4 grid steps so a megacore part ("parallel") has work per core.
        cap = max(128, _round_up(-(-n // 4), 128))
        tm = min(tm, cap)
    return tm


def _mlp_kernel(x_ref, w1T_ref, b1_ref, w2T_ref, b2_ref, w3_ref, b3_ref, o_ref):
    # x_ref: (TM, D) f32 row-major tile. Contract D against w1T's D so the
    # transpose happens on-chip and all intermediates are lane-dense (H, TM).
    h1 = lax.dot_general(w1T_ref[...], x_ref[...],
                         (((1,), (1,)), ((), ())),
                         preferred_element_type=jnp.float32)          # (H, TM)
    h1 = jnp.maximum(h1 + b1_ref[...], 0.0)
    # Layer 2: (H, H) @ (H, TM) -> (H, TM).
    h2 = jnp.dot(w2T_ref[...], h1, preferred_element_type=jnp.float32)
    h2 = jnp.maximum(h2 + b2_ref[...], 0.0)
    # Output layer Linear(H -> 1): VPU multiply + sublane (XLU) reduction instead
    # of a width-1 MXU matmul; result is a lane-dense (1, TM) slab.
    out = jnp.sum(h2 * w3_ref[...], axis=0, keepdims=True) + b3_ref[...]
    o_ref[...] = out.astype(o_ref.dtype)


@functools.partial(jax.jit, static_argnames=("input_dim",))
def unnormalized_baseline(x, params, *, input_dim):
    """Pallas implementation of UnnormalizedBaseline.forward (default n_layers=1).

    x: any shape that flattens to (-1, input_dim)
    params: dict with w1 (in,h), b1 (1,h), w2 (h,h), b2 (1,h), w3 (h,1), b3 (1,1)
    returns: (N, 1) f32 scores, N = x.size // input_dim
    """
    x2d = x.reshape(-1, input_dim).astype(jnp.float32)
    n = x2d.shape[0]
    hidden = params["w1"].shape[1]

    if n == 0:  # empty input: nothing to score
        return jnp.zeros((0, 1), jnp.float32)

    tm = _choose_tm(n, input_dim, hidden)
    n_pad = _round_up(n, tm)
    x_pad = x2d if n_pad == n else jnp.pad(x2d, ((0, n_pad - n), (0, 0)))

    # f32 weights, feature-major where it helps (w^T so the MXU output is (H, TM)).
    w1T = params["w1"].T.astype(jnp.float32)                   # (H, D)
    w2T = params["w2"].T.astype(jnp.float32)                   # (H, H)
    b1c = params["b1"].reshape(hidden, 1).astype(jnp.float32)  # (H, 1)
    b2c = params["b2"].reshape(hidden, 1).astype(jnp.float32)  # (H, 1)
    w3c = params["w3"].reshape(hidden, 1).astype(jnp.float32)  # (H, 1)
    b3c = params["b3"].reshape(1, 1).astype(jnp.float32)       # (1, 1)

    # Resident (constant index_map) weight specs, single-buffered.
    def resident(a):
        return pl.BlockSpec(a.shape, lambda i: (0, 0), pipeline_mode=pl.Buffered(1))

    # Explicit VMEM budget: double-buffered x/out tiles + single-buffered weights
    # + (H, TM) intermediates, with margin.  Stays within v7x's 64 MiB physical.
    weight_bytes = 4 * (hidden * input_dim + hidden * hidden + 3 * hidden + 1)
    vmem_bytes = (2 * tm * input_dim * 4    # x tiles (double-buffered)
                  + 2 * tm * 4              # out tiles (double-buffered)
                  + weight_bytes            # resident weights/biases
                  + 6 * hidden * tm * 4     # (H, TM) intermediates + slack
                  + (4 << 20))
    vmem_limit = int(min(max(vmem_bytes, 16 << 20), 96 << 20))

    flops = 2 * n_pad * (input_dim * hidden + hidden * hidden + hidden)
    bytes_accessed = 4 * (n_pad * input_dim + n_pad) + weight_bytes

    out = pl.pallas_call(
        _mlp_kernel,
        out_shape=jax.ShapeDtypeStruct((1, n_pad), jnp.float32),
        grid=(n_pad // tm,),
        in_specs=[
            pl.BlockSpec((tm, input_dim), lambda i: (i, 0)),   # pipelined x tiles
            resident(w1T), resident(b1c),
            resident(w2T), resident(b2c),
            resident(w3c), resident(b3c),
        ],
        out_specs=pl.BlockSpec((1, tm), lambda i: (0, i)),     # lane-dense output slab
        compiler_params=pltpu.CompilerParams(
            dimension_semantics=("parallel",),
            vmem_limit_bytes=vmem_limit),
        cost_estimate=pl.CostEstimate(
            flops=int(flops), transcendentals=0,
            bytes_accessed=int(bytes_accessed)),
    )(x_pad, w1T, b1c, w2T, b2c, w3c, b3c)

    # Back to the PyTorch (N, 1) layout; drop padded columns.
    return out[0, :n].reshape(n, 1)


def init_params(key, input_dim, hidden_dim):
    """Deterministic synthetic init (shapes match nn.Linear params, stored as (in,out))."""
    k1, k2, k3, k4, k5, k6 = jax.random.split(key, 6)
    s1 = 1.0 / jnp.sqrt(input_dim)
    s2 = 1.0 / jnp.sqrt(hidden_dim)
    return {
        "w1": jax.random.uniform(k1, (input_dim, hidden_dim), jnp.float32, -s1, s1),
        "b1": jax.random.uniform(k2, (1, hidden_dim), jnp.float32, -s1, s1),
        "w2": jax.random.uniform(k3, (hidden_dim, hidden_dim), jnp.float32, -s2, s2),
        "b2": jax.random.uniform(k4, (1, hidden_dim), jnp.float32, -s2, s2),
        "w3": jax.random.uniform(k5, (hidden_dim, 1), jnp.float32, -s2, s2),
        "b3": jax.random.uniform(k6, (1, 1), jnp.float32, -s2, s2),
    }


if __name__ == "__main__":
    input_dim = 16
    hidden_dim = 32

    key = jax.random.PRNGKey(0)
    kx, kp = jax.random.split(key)
    # (batch=2, seq=8, input_dim=16) tensor; forward flattens to (16, 16).
    x = jax.random.normal(kx, (2, 8, input_dim), dtype=jnp.float32)
    params = init_params(kp, input_dim, hidden_dim)

    scores = unnormalized_baseline(x, params, input_dim=input_dim)
    scores = jax.block_until_ready(scores)

    # Pure-JAX f32 reference (matches the f32 PyTorch module).
    x2d = x.reshape(-1, input_dim)
    h1 = jnp.maximum(x2d @ params["w1"] + params["b1"], 0.0)
    h2 = jnp.maximum(h1 @ params["w2"] + params["b2"], 0.0)
    ref = h2 @ params["w3"] + params["b3"]

    assert scores.shape == (x.size // input_dim, 1)
    assert jnp.allclose(scores, ref, atol=5e-3, rtol=5e-3), (
        float(jnp.max(jnp.abs(scores - ref))))

    print("KERNEL_OK")
</pallas_src>

<mosaic_0001>
module attributes {stable_mosaic.version = 11 : i64} {
  func.func @_mlp_kernel(%arg0: i32, %arg1: memref<128x16xf32, #tpu.memory_space<vmem>>, %arg2: memref<32x16xf32, #tpu.memory_space<vmem>>, %arg3: memref<32x1xf32, #tpu.memory_space<vmem>>, %arg4: memref<32x32xf32, #tpu.memory_space<vmem>>, %arg5: memref<32x1xf32, #tpu.memory_space<vmem>>, %arg6: memref<32x1xf32, #tpu.memory_space<vmem>>, %arg7: memref<1x1xf32, #tpu.memory_space<vmem>>, %arg8: memref<1x128xf32, #tpu.memory_space<vmem>>) attributes {dimension_semantics = [#tpu.dimension_semantics<parallel>], iteration_bounds = array<i64: 1>, scalar_prefetch = 0 : i64, scratch_operands = 0 : i64, tpu.core_type = #tpu.core_type<tc>, window_params = [{transform_indices = @transform_0, window_bounds = array<i64: 128, 16>}, {pipeline_mode = #tpu.pipeline_mode<synchronous>, transform_indices = @transform_1, window_bounds = array<i64: 32, 16>}, {pipeline_mode = #tpu.pipeline_mode<synchronous>, transform_indices = @transform_2, window_bounds = array<i64: 32, 1>}, {pipeline_mode = #tpu.pipeline_mode<synchronous>, transform_indices = @transform_3, window_bounds = array<i64: 32, 32>}, {pipeline_mode = #tpu.pipeline_mode<synchronous>, transform_indices = @transform_4, window_bounds = array<i64: 32, 1>}, {pipeline_mode = #tpu.pipeline_mode<synchronous>, transform_indices = @transform_5, window_bounds = array<i64: 32, 1>}, {pipeline_mode = #tpu.pipeline_mode<synchronous>, transform_indices = @transform_6, window_bounds = array<i64: 1, 1>}, {transform_indices = @transform_7, window_bounds = array<i64: 1, 128>}]} {
    %c0 = arith.constant 0 : index
    %c0_0 = arith.constant 0 : index
    %0 = vector.load %arg2[%c0, %c0_0] : memref<32x16xf32, #tpu.memory_space<vmem>>, vector<32x16xf32>
    %c0_1 = arith.constant 0 : index
    %c0_2 = arith.constant 0 : index
    %1 = vector.load %arg1[%c0_1, %c0_2] : memref<128x16xf32, #tpu.memory_space<vmem>>, vector<128x16xf32>
    %cst = arith.constant dense<0.000000e+00> : vector<32x128xf32>
    %2 = tpu.matmul %0, %1, %cst {dimension_numbers = #tpu.dot_dimension_numbers<[1], [1], [0], [0], [0, 0, 1, 0], [], []>} : vector<32x16xf32>, vector<128x16xf32>, vector<32x128xf32> -> vector<32x128xf32>
    %c0_3 = arith.constant 0 : index
    %c0_4 = arith.constant 0 : index
    %3 = vector.load %arg3[%c0_3, %c0_4] : memref<32x1xf32, #tpu.memory_space<vmem>>, vector<32x1xf32>
    %4 = vector.broadcast %3 : vector<32x1xf32> to vector<32x128xf32>
    %5 = arith.addf %2, %4 : vector<32x128xf32>
    %cst_5 = arith.constant 0.000000e+00 : f32
    %6 = vector.broadcast %cst_5 : f32 to vector<32x128xf32>
    %7 = arith.maximumf %5, %6 : vector<32x128xf32>
    %c0_6 = arith.constant 0 : index
    %c0_7 = arith.constant 0 : index
    %8 = vector.load %arg4[%c0_6, %c0_7] : memref<32x32xf32, #tpu.memory_space<vmem>>, vector<32x32xf32>
    %cst_8 = arith.constant dense<0.000000e+00> : vector<32x128xf32>
    %9 = tpu.matmul %8, %7, %cst_8 {dimension_numbers = #tpu.dot_dimension_numbers<[1], [0], [0], [1], [0, 0, 1, 1], [], []>} : vector<32x32xf32>, vector<32x128xf32>, vector<32x128xf32> -> vector<32x128xf32>
    %c0_9 = arith.constant 0 : index
    %c0_10 = arith.constant 0 : index
    %10 = vector.load %arg5[%c0_9, %c0_10] : memref<32x1xf32, #tpu.memory_space<vmem>>, vector<32x1xf32>
    %11 = vector.broadcast %10 : vector<32x1xf32> to vector<32x128xf32>
    %12 = arith.addf %9, %11 : vector<32x128xf32>
    %cst_11 = arith.constant 0.000000e+00 : f32
    %13 = vector.broadcast %cst_11 : f32 to vector<32x128xf32>
    %14 = arith.maximumf %12, %13 : vector<32x128xf32>
    %c0_12 = arith.constant 0 : index
    %c0_13 = arith.constant 0 : index
    %15 = vector.load %arg6[%c0_12, %c0_13] : memref<32x1xf32, #tpu.memory_space<vmem>>, vector<32x1xf32>
    %16 = vector.broadcast %15 : vector<32x1xf32> to vector<32x128xf32>
    %17 = arith.mulf %14, %16 : vector<32x128xf32>
    %cst_14 = arith.constant dense<0.000000e+00> : vector<128xf32>
    %18 = vector.multi_reduction <add>, %17, %cst_14 [0] : vector<32x128xf32> to vector<128xf32>
    %19 = vector.shape_cast %18 : vector<128xf32> to vector<1x128xf32>
    %c0_15 = arith.constant 0 : index
    %c0_16 = arith.constant 0 : index
    %20 = vector.load %arg7[%c0_15, %c0_16] : memref<1x1xf32, #tpu.memory_space<vmem>>, vector<1x1xf32>
    %21 = vector.broadcast %20 : vector<1x1xf32> to vector<1x128xf32>
    %22 = arith.addf %19, %21 : vector<1x128xf32>
    %c0_17 = arith.constant 0 : index
    %c0_18 = arith.constant 0 : index
    %23 = vector.load %arg8[%c0_17, %c0_18] : memref<1x128xf32, #tpu.memory_space<vmem>>, vector<1x128xf32>
    tpu.vector_store %arg8[%c0_17, %c0_18], %22 {strides = array<i32>} : memref<1x128xf32, #tpu.memory_space<vmem>>, vector<1x128xf32>,
    return
  }
  func.func @transform_0(%arg0: i32) -> (i32, i32) {
    %c0_i32 = arith.constant 0 : i32
    %c0_i32_0 = arith.constant 0 : i32
    return %arg0, %c0_i32 : i32, i32
  }
  func.func @transform_1(%arg0: i32) -> (i32, i32) {
    %c0_i32 = arith.constant 0 : i32
    %c0_i32_0 = arith.constant 0 : i32
    %c0_i32_1 = arith.constant 0 : i32
    return %c0_i32, %c0_i32_0 : i32, i32
  }
  func.func @transform_2(%arg0: i32) -> (i32, i32) {
    %c0_i32 = arith.constant 0 : i32
    %c0_i32_0 = arith.constant 0 : i32
    %c0_i32_1 = arith.constant 0 : i32
    return %c0_i32, %c0_i32_0 : i32, i32
  }
  func.func @transform_3(%arg0: i32) -> (i32, i32) {
    %c0_i32 = arith.constant 0 : i32
    %c0_i32_0 = arith.constant 0 : i32
    %c0_i32_1 = arith.constant 0 : i32
    return %c0_i32, %c0_i32_0 : i32, i32
  }
  func.func @transform_4(%arg0: i32) -> (i32, i32) {
    %c0_i32 = arith.constant 0 : i32
    %c0_i32_0 = arith.constant 0 : i32
    %c0_i32_1 = arith.constant 0 : i32
    return %c0_i32, %c0_i32_0 : i32, i32
  }
  func.func @transform_5(%arg0: i32) -> (i32, i32) {
    %c0_i32 = arith.constant 0 : i32
    %c0_i32_0 = arith.constant 0 : i32
    %c0_i32_1 = arith.constant 0 : i32
    return %c0_i32, %c0_i32_0 : i32, i32
  }
  func.func @transform_6(%arg0: i32) -> (i32, i32) {
    %c0_i32 = arith.constant 0 : i32
    %c0_i32_0 = arith.constant 0 : i32
    %c0_i32_1 = arith.constant 0 : i32
    return %c0_i32, %c0_i32_0 : i32, i32
  }
  func.func @transform_7(%arg0: i32) -> (i32, i32) {
    %c0_i32 = arith.constant 0 : i32
    %c0_i32_0 = arith.constant 0 : i32
    return %c0_i32, %arg0 : i32, i32
  }
}

</mosaic_0001>

<bundles_post_ra>
// kernel: unnormalized_baseline.1
= control target key start
LH: loop header
LB: loop body
LE: loop exit
PB: predicated region body
PF: predicated region fallthrough
CT: control target
= control target key end

     0   :  { %vm72_vm0 = vcmask 130048   ;;  %v512_v2 = vmov 0   ;;  %vm250_vm1 = vcmask 261120   ;;  %s707_s0 = inlined_call_operand.vmem [shape: f32[128,16], index: 0, kind: input, shape index: {}]   ;;  %s708_s6 = inlined_call_operand.<no memory space> [shape: f32[1,1], index: 6, kind: input, shape index: {}]   ;;  %s709_s1 = inlined_call_operand.vmem [shape: f32[32,16], index: 1, kind: input, shape index: {}]   ;;  %s710_s2 = inlined_call_operand.vmem [shape: f32[32,1], index: 2, kind: input, shape index: {}]   ;;  %s711_s4 = inlined_call_operand.vmem [shape: f32[32,1], index: 4, kind: input, shape index: {}]   ;;  %s712_s5 = inlined_call_operand.vmem [shape: f32[32,1], index: 5, kind: input, shape index: {}]   ;;  %s713_s3 = inlined_call_operand.vmem [shape: f32[32,32], index: 3, kind: input, shape index: {}]   ;;  %s714_s7 = inlined_call_operand.vmem [shape: f32[1,128], index: 7, kind: output, shape index: {}]  }
   0x1   :  { %v47_v0 = vld [vmem:[%s707_s0 + $0x78] sm:$0xff]  ;;  %v46_v1 = vld [vmem:[%s707_s0 + $0x70] sm:$0xff]  ;;  %510 = vset.pattern.permute.xlu0 %v512_v2  ;;  %511 = vset.pattern.permute.xlu1 %v512_v2  ;;  %v12_v3 = vstv %s708_s6  ;;  %v45_v4 = vld [vmem:[%s707_s0 + $0x68] sm:$0xff] }
   0x2   :  { %457 = vmatprep.subr.msk.mxu0 %vm72_vm0, %v47_v0  ;;  %13 = vst [vmem:[#allocation2] sm:$0x1] %v12_v3  ;;  %v28_v5 = vld [vmem:[%s709_s1] sm:$0xff]  ;;  %v51_v6 = vld [vmem:[%s710_s2 + $0x18] sm:$0xff]  ;;  %v49_v7 = vld [vmem:[%s710_s2 + $0x8] sm:$0xff] }
   0x3   :  { %458 = vmatpush3.xpose.msk.msra.mxu0 %vm72_vm0, %v47_v0  ;;  %489 = vmatprep.mubr.msk.f32.mxu0 %vm72_vm0, %v28_v5  ;;  %v44_v8 = vld [vmem:[%s707_s0 + $0x60] sm:$0xff]  ;;  %v50_v9 = vld [vmem:[%s710_s2 + $0x10] sm:$0xff]  ;;  %v43_v11 = vld [vmem:[%s707_s0 + $0x58] sm:$0xff] }
   0x4   :  { %459 = vmatprep.subr.msk.mxu0 %vm72_vm0, %v46_v1  ;;  %69 = vperm.xlu0 %510, %v51_v6   ;;  %v48_v10 = vld [vmem:[%s710_s2] sm:$0xff]  ;;  %v227_v13 = vld [vmem:[%s711_s4 + $0x8] sm:$0xff]  ;;  %v42_v14 = vld [vmem:[%s707_s0 + $0x50] sm:$0xff] }
   0x5   :  { %59 = vperm.xlu1 %511, %v49_v7   ;;  %v226_v12 = vld [vmem:[%s711_s4] sm:$0xff]  ;;  %v228_v15 = vld [vmem:[%s711_s4 + $0x10] sm:$0xff]  ;;  %v229_v16 = vld [vmem:[%s711_s4 + $0x18] sm:$0xff] }
   0x6   :  { %v41_v17 = vld [vmem:[%s707_s0 + $0x48] sm:$0xff]  ;;  %v352_v18 = vld [vmem:[%s712_s5] sm:$0xff]  ;;  %v354_v21 = vld [vmem:[%s712_s5 + $0x10] sm:$0xff] }
   0x7   :  { %460 = vmatpush3.xpose.msk.msra.mxu0 %vm72_vm0, %v46_v1  ;;  %v353_v19 = vld [vmem:[%s712_s5 + $0x8] sm:$0xff]  ;;  %v40_v20 = vld [vmem:[%s707_s0 + $0x40] sm:$0xff]  ;;  %v355_v22 = vld [vmem:[%s712_s5 + $0x18] sm:$0xff] }
   0x8   :  { %461 = vmatprep.subr.msk.mxu0 %vm72_vm0, %v45_v4  ;;  %64 = vperm.xlu0 %510, %v50_v9   ;;  %v39_v23 = vld [vmem:[%s707_s0 + $0x38] sm:$0xff]  ;;  %v38_v25 = vld [vmem:[%s707_s0 + $0x30] sm:$0xff]  ;;  %v37_v26 = vld [vmem:[%s707_s0 + $0x28] sm:$0xff] }
   0x9   :  { %54 = vperm.xlu1 %511, %v48_v10   ;;  %v389_v24 = vld [vmem:[#allocation2] sm:$0x1]  ;;  %v35_v28 = vld [vmem:[%s707_s0 + $0x18] sm:$0xff]  ;;  %v34_v29 = vld [vmem:[%s707_s0 + $0x10] sm:$0xff] }
   0xa   :  { %v36_v27 = vld [vmem:[%s707_s0 + $0x20] sm:$0xff]  ;;  %v33_v30 = vld [vmem:[%s707_s0 + $0x8] sm:$0xff]  ;;  %v30_v33 = vld [vmem:[%s709_s1 + $0x10] sm:$0xff] }
   0xb   :  { %462 = vmatpush3.xpose.msk.msra.mxu0 %vm72_vm0, %v45_v4  ;;  %v32_v31 = vld [vmem:[%s707_s0] sm:$0xff]  ;;  %v29_v32 = vld [vmem:[%s709_s1 + $0x8] sm:$0xff]  ;;  %v31_v34 = vld [vmem:[%s709_s1 + $0x18] sm:$0xff] }
   0xc   :  { %463 = vmatprep.subr.msk.mxu0 %vm72_vm0, %v44_v8  ;;  %232 = vperm.xlu0 %510, %v226_v12   ;;  %v222_v35 = vld [vmem:[%s713_s3] sm:$0xff]  ;;  %v223_v52 = vld [vmem:[%s713_s3 + $0x8] sm:$0xff]  ;;  %v224_v53 = vld [vmem:[%s713_s3 + $0x10] sm:$0xff] }
   0xd   :  { %237 = vperm.xlu1 %511, %v227_v13   ;;  %503 = vmatprep.mubr.msk.f32.mxu1 %vm250_vm1, %v222_v35  ;;  %v225_v54 = vld [vmem:[%s713_s3 + $0x18] sm:$0xff] }
   0xf   :  { %464 = vmatpush3.xpose.msk.msra.mxu0 %vm72_vm0, %v44_v8 }
  0x10   :  { %465 = vmatprep.subr.msk.mxu0 %vm72_vm0, %v43_v11  ;;  %242 = vperm.xlu0 %510, %v228_v15  }
  0x11   :  { %247 = vperm.xlu1 %511, %v229_v16  }
  0x13   :  { %466 = vmatpush3.xpose.msk.msra.mxu0 %vm72_vm0, %v43_v11 }
  0x14   :  { %467 = vmatprep.subr.msk.mxu0 %vm72_vm0, %v42_v14  ;;  %358 = vperm.xlu0 %510, %v352_v18  }
  0x15   :  { %363 = vperm.xlu1 %511, %v353_v19  }
  0x17   :  { %468 = vmatpush3.xpose.msk.msra.mxu0 %vm72_vm0, %v42_v14 }
  0x18   :  { %469 = vmatprep.subr.msk.mxu0 %vm72_vm0, %v41_v17  ;;  %368 = vperm.xlu0 %510, %v354_v21  }
  0x19   :  { %373 = vperm.xlu1 %511, %v355_v22  }
  0x1b   :  { %470 = vmatpush3.xpose.msk.msra.mxu0 %vm72_vm0, %v41_v17  ;;  %v395_v17 = vlaneseq }
  0x1c   :  { %471 = vmatprep.subr.msk.mxu0 %vm72_vm0, %v40_v20  ;;  %392 = vperm.xlu0 %510, %v389_v24  }
  0x1f   :  { %472 = vmatpush3.xpose.msk.msra.mxu0 %vm72_vm0, %v40_v20  ;;  %v396_v20 = vshrl.u32 %v395_v17, 7 }
  0x20   :  { %473 = vmatprep.subr.msk.mxu0 %vm72_vm0, %v39_v23 }
  0x23   :  { %474 = vmatpush3.xpose.msk.msra.mxu0 %vm72_vm0, %v39_v23  ;;  %v397_v23 = vsub.s32 0, %v396_v20 }
  0x24   :  { %475 = vmatprep.subr.msk.mxu0 %vm72_vm0, %v38_v25 }
  0x27   :  { %476 = vmatpush3.xpose.msk.msra.mxu0 %vm72_vm0, %v38_v25 }
  0x28   :  { %477 = vmatprep.subr.msk.mxu0 %vm72_vm0, %v37_v26 }
  0x2b   :  { %478 = vmatpush3.xpose.msk.msra.mxu0 %vm72_vm0, %v37_v26 }
  0x2c   :  { %479 = vmatprep.subr.msk.mxu0 %vm72_vm0, %v36_v27 }
  0x2f   :  { %480 = vmatpush3.xpose.msk.msra.mxu0 %vm72_vm0, %v36_v27 }
  0x30   :  { %481 = vmatprep.subr.msk.mxu0 %vm72_vm0, %v35_v28 }
  0x33   :  { %482 = vmatpush3.xpose.msk.msra.mxu0 %vm72_vm0, %v35_v28 }
  0x34   :  { %483 = vmatprep.subr.msk.mxu0 %vm72_vm0, %v34_v29 }
  0x37   :  { %484 = vmatpush3.xpose.msk.msra.mxu0 %vm72_vm0, %v34_v29 }
  0x38   :  { %485 = vmatprep.subr.msk.mxu0 %vm72_vm0, %v33_v30 }
  0x3b   :  { %486 = vmatpush3.xpose.msk.msra.mxu0 %vm72_vm0, %v33_v30 }
  0x3c   :  { %487 = vmatprep.subr.msk.mxu0 %vm72_vm0, %v32_v31 }
  0x3f   :  { %488 = vmatpush3.xpose.msk.msra.mxu0 %vm72_vm0, %v32_v31 }
  0x42   :  { %490 = vmatmul.mubr.msk.f32.vlgmr.msra.gmra.mxu0 %vm72_vm0, %v29_v32 }
  0x43   :  { %492 = vmatprep.mubr.msk.f32.mxu0 %vm72_vm0, %v30_v33 }
  0x46   :  { %493 = vmatmul.mubr.msk.f32.gmra.mxu0 %vm72_vm0, %v31_v34 }
  0x7f   :  { %v70_v36 = vpop.permute.xlu0 %69 }
  0x80   :  { %v60_v38 = vpop.permute.xlu1 %59 }
  0x83   :  { %v65_v42 = vpop.permute.xlu0 %64 }
  0x84   :  { %v55_v47 = vpop.permute.xlu1 %54 }
  0x87   :  { %v233_v55 = vpop.permute.xlu0 %232 }
  0x88   :  { %v238_v56 = vpop.permute.xlu1 %237 }
  0x8b   :  { %v243_v57 = vpop.permute.xlu0 %242 }
  0x8c   :  { %v248_v58 = vpop.permute.xlu1 %247 }
  0x8f   :  { %v359_v63 = vpop.permute.xlu0 %358 }
  0x90   :  { %v364_v4 = vpop.permute.xlu1 %363 }
  0x93   :  { %v369_v11 = vpop.permute.xlu0 %368 }
  0x94   :  { %v374_v14 = vpop.permute.xlu1 %373 }
  0x97   :  { %v393_v25 = vpop.permute.xlu0 %392 }
  0x98   :  { %v398_v27 = vrot.slane %v393_v25, %v397_v23 }
 0x102   :  { %v491_v37 = vpop.f32.mrf.mxu0 }
 0x103   :  { %v205_v44 = vadd.f32 %v491_v37, %v60_v38 }
 0x104   :  { %v199_v39 = vpop.f32.mrf.mxu0 }
 0x105   :  { %v200_v48 = vadd.f32 %v199_v39, %v55_v47  ;;  %v219_v50 = vmax.f32 %v205_v44, 0.0 }
 0x106   :  { %v494_v40 = vpop.f32.mrf.mxu0 }
 0x107   :  { %v215_v41 = vadd.f32 %v494_v40, %v70_v36  ;;  %v218_v51 = vmax.f32 %v200_v48, 0.0 }
 0x108   :  { %v209_v43 = vpop.f32.mrf.mxu0 }
 0x109   :  { %v221_v45 = vmax.f32 %v215_v41, 0.0  ;;  %v210_v46 = vadd.f32 %v209_v43, %v65_v42 }
 0x10b   :  { %v220_v49 = vmax.f32 %v210_v46, 0.0  ;;  %495 = vmatprep.subr.mxu1 %v221_v45 }
 0x10c   :  { %496 = vmatpush3.msra.mxu1 %v221_v45 }
 0x10d   :  { %497 = vmatprep.subr.mxu1 %v220_v49 }
 0x10e   :  { %498 = vmatpush3.msra.mxu1 %v220_v49 }
 0x10f   :  { %499 = vmatprep.subr.mxu1 %v219_v50 }
 0x110   :  { %500 = vmatpush3.msra.mxu1 %v219_v50 }
 0x111   :  { %501 = vmatprep.subr.mxu1 %v218_v51 }
 0x112   :  { %502 = vmatpush3.msra.mxu1 %v218_v51 }
 0x113   :  { %504 = vmatmul.mubr.msk.f32.vlgmr.msra.gmra.mxu1 %vm250_vm1, %v223_v52 }
 0x114   :  { %506 = vmatprep.mubr.msk.f32.mxu1 %vm250_vm1, %v224_v53 }
 0x117   :  { %507 = vmatmul.mubr.msk.f32.gmra.mxu1 %vm250_vm1, %v225_v54 }
 0x1d3   :  { %v505_v59 = vpop.f32.mrf.mxu1 }
 0x1d4   :  { %v335_v60 = vadd.f32 %v505_v59, %v238_v56 }
 0x1d5   :  { %v329_v61 = vpop.f32.mrf.mxu1 }
 0x1d6   :  { %v330_v62 = vadd.f32 %v329_v61, %v233_v55  ;;  %v349_v1 = vmax.f32 %v335_v60, 0.0 }
 0x1d7   :  { %v508_v0 = vpop.f32.mrf.mxu1 }
 0x1d8   :  { %v348_v2 = vmax.f32 %v330_v62, 0.0  ;;  %v345_v3 = vadd.f32 %v508_v0, %v248_v58  ;;  %v377_v8 = vmul.f32 %v364_v4, %v349_v1 }
 0x1d9   :  { %v339_v5 = vpop.f32.mrf.mxu1 }
 0x1da   :  { %v376_v6 = vmul.f32 %v359_v63, %v348_v2  ;;  %v340_v7 = vadd.f32 %v339_v5, %v243_v57  ;;  %v351_v9 = vmax.f32 %v345_v3, 0.0 }
 0x1dc   :  { %v350_v10 = vmax.f32 %v340_v7, 0.0  ;;  %v380_v12 = vadd.f32 %v377_v8, %v376_v6  ;;  %v379_v15 = vmul.f32 %v374_v14, %v351_v9 }
 0x1de   :  { %v378_v13 = vmul.f32 %v369_v11, %v350_v10 }
 0x1e0   :  { %v381_v16 = vadd.f32 %v380_v12, %v378_v13 }
 0x1e2   :  { %v382_v18 = vadd.f32 %v381_v16, %v379_v15 }
 0x1e4   :  { %v383_v19 = vrot.slane %v382_v18, 4 }
 0x1e6   :  { %v384_v21 = vadd.f32 %v383_v19, %v382_v18 }
 0x1e8   :  { %v385_v22 = vrot.slane %v384_v21, 2 }
 0x1ea   :  { %v386_v24 = vadd.f32 %v385_v22, %v384_v21 }
 0x1ec   :  { %v387_v26 = vrot.slane %v386_v24, 1 }
 0x1ee   :  { %v388_v28 = vadd.f32 %v387_v26, %v386_v24 }
 0x1f0   :  { %v399_v29 = vadd.f32 %v398_v27, %v388_v28 }
 0x1f2   :  { %400 = vst [vmem:[%s714_s7] sm:$0x1] %v399_v29 }

</bundles_post_ra>
